<compile_context>
chip_gen: v5e
topology: v5e:2x2
jax: 0.10.0
libtpu: 0.0.40
codegen_flags: <defaults>
</compile_context>

<pallas_src>
import functools

import jax
import jax.numpy as jnp
from jax import lax
from jax.experimental import pallas as pl
from jax.experimental.pallas import tpu as pltpu

_LANES = 128
_MIN_ROW_LANES = 512        # >= 2 KiB contiguous per DMA row (HBM burst eff.)


def _tpu_budgets():
    """(x-block bytes, scoped-VMEM limit bytes), generation-aware."""
    try:
        cap = int(getattr(pltpu.get_tpu_info(), "vmem_capacity_bytes", 0))
    except Exception:                       # query unavailable -> conservative
        cap = 0
    if cap >= 100 * 1024 * 1024:            # v5e / v6e: 128 MiB physical
        return 8 * 1024 * 1024, 64 * 1024 * 1024
    if cap > 0:                             # v7x: 64 MiB per TensorCore
        return 5 * 1024 * 1024, 40 * 1024 * 1024
    return 4 * 1024 * 1024, 32 * 1024 * 1024


_TILE_BYTES, _VMEM_LIMIT_BYTES = _tpu_budgets()


def _pick_hw_tile(hw: int, c: int, tile_bytes: int) -> int:
    """Largest multiple-of-128 tile that evenly divides HW, keeps one
    (C, tile) f32 block near `tile_bytes`, and keeps each strided-DMA row at
    least ~2 KiB contiguous.  Falls back to the full extent (always a legal
    block shape) when HW is not a multiple of 128."""
    if hw % _LANES != 0:
        # TODO(synk): for very large C*HW with HW % 128 != 0, tile H with a
        # 4-D (1, C, h_t, W) block instead of taking the full-HW fallback.
        return hw
    max_t = tile_bytes // (4 * max(c, 1))
    max_t = max(max_t, _MIN_ROW_LANES)      # row-length floor
    max_t = min(max_t, hw)
    best = _LANES
    t = _LANES
    while t <= max_t:
        if hw % t == 0:
            best = t
        t += _LANES
    return best


# --------------------------- two-pass kernels -------------------------------

def _bn_stats_kernel(x_ref, psum_ref, psq_ref):
    """Per-N, per-channel sum and sum-of-squares, accumulated over HW tiles.

    Pure VPU accumulation (vreg adds, ~3 VALU ops per loaded vreg) plus one
    small cross-lane reduce per grid step -- the pass stays HBM-bound.
    Outputs are per-N partials so the N grid axis can be 'parallel'.
    """
    @pl.when(pl.program_id(1) == 0)
    def _():
        psum_ref[...] = jnp.zeros_like(psum_ref)
        psq_ref[...] = jnp.zeros_like(psq_ref)

    x = x_ref[0]                                            # (C, hw_t) f32
    psum_ref[0] += jnp.sum(x, axis=-1, keepdims=True)       # (C, 1)
    psq_ref[0] += jnp.sum(x * x, axis=-1, keepdims=True)    # (C, 1)


def _bn_apply_kernel(x_ref, scale_ref, shift_ref, o_ref):
    """y = x * scale + shift with per-channel (C, 1) scale/shift broadcast."""
    o_ref[0] = x_ref[0] * scale_ref[...] + shift_ref[...]


# --------------------------- fused single-pass kernel -----------------------

def _bn_fused_kernel(x_ref, gamma_ref, beta_ref, y_ref, mean_ref, var_ref,
                     *, eps, inv_m):
    """Single-pass BatchNorm for activations that fit in VMEM.

    x is read from HBM once; the second read for normalization hits VMEM.
    """
    n, c, _ = x_ref.shape
    s = jnp.zeros((c, 1), jnp.float32)
    q = jnp.zeros((c, 1), jnp.float32)
    for i in range(n):                       # static unroll; n is small here
        xi = x_ref[i]                                       # (C, HW)
        s = s + jnp.sum(xi, axis=-1, keepdims=True)
        q = q + jnp.sum(xi * xi, axis=-1, keepdims=True)
    mean = s * inv_m
    var = jnp.maximum(q * inv_m - mean * mean, 0.0)         # biased variance
    inv_std = lax.rsqrt(var + eps)                          # EUP
    scale = gamma_ref[...] * inv_std
    shift = beta_ref[...] - mean * scale
    for i in range(n):
        y_ref[i] = x_ref[i] * scale + shift
    mean_ref[...] = mean
    var_ref[...] = var


# --------------------------- wrapper -----------------------------------------

@functools.partial(
    jax.jit,
    static_argnames=("eps", "momentum", "force_two_pass", "tile_bytes"))
def batchnorm_forward(x, gamma, beta, mu_running, sigma_running,
                      eps=1e-5, momentum=0.1, force_two_pass=False,
                      tile_bytes=None):
    """Training-mode BatchNorm2d forward matching the spec module.

    Args:
      x: (N, C, H, W) float32
      gamma, beta, mu_running, sigma_running: (C,) float32
    Returns:
      (y, new_mu_running, new_sigma_running), y of shape (N, C, H, W).
    """
    N, C, H, W = x.shape
    HW = H * W
    M = N * HW
    tb = _TILE_BYTES if tile_bytes is None else int(tile_bytes)

    x3 = x.reshape(N, C, HW).astype(jnp.float32)   # free: no transpose/copy
    gamma_f = gamma.astype(jnp.float32)
    beta_f = beta.astype(jnp.float32)

    x_bytes = N * C * HW * 4
    fused_ok = (not force_two_pass
                and x_bytes <= min(_VMEM_LIMIT_BYTES // 3, 16 * 1024 * 1024)
                and N <= 64)

    if fused_ok:
        # ---- Fused single-pass path: 1 HBM read + 1 HBM write --------------
        y3, mean2, var2 = pl.pallas_call(
            functools.partial(_bn_fused_kernel, eps=float(eps), inv_m=1.0 / M),
            out_shape=(jax.ShapeDtypeStruct((N, C, HW), jnp.float32),
                       jax.ShapeDtypeStruct((C, 1), jnp.float32),
                       jax.ShapeDtypeStruct((C, 1), jnp.float32)),
            compiler_params=pltpu.CompilerParams(
                vmem_limit_bytes=_VMEM_LIMIT_BYTES),
        )(x3, gamma_f.reshape(C, 1), beta_f.reshape(C, 1))
        mean = mean2[:, 0]
        var = var2[:, 0]
    else:
        # ---- Two-pass streaming path ---------------------------------------
        hw_t = _pick_hw_tile(HW, C, tb)
        n_hw = HW // hw_t
        grid = (N, n_hw)

        # Phase 1: per-N, per-channel sum / sum-of-squares (pass 1 over x).
        psum, psq = pl.pallas_call(
            _bn_stats_kernel,
            out_shape=(jax.ShapeDtypeStruct((N, C, 1), jnp.float32),
                       jax.ShapeDtypeStruct((N, C, 1), jnp.float32)),
            grid=grid,
            in_specs=[pl.BlockSpec((1, C, hw_t), lambda n, t: (n, 0, t))],
            out_specs=(pl.BlockSpec((1, C, 1), lambda n, t: (n, 0, 0)),
                       pl.BlockSpec((1, C, 1), lambda n, t: (n, 0, 0))),
            compiler_params=pltpu.CompilerParams(
                dimension_semantics=("parallel", "arbitrary"),
                vmem_limit_bytes=_VMEM_LIMIT_BYTES),
        )(x3)

        # Tiny glue: reduce N partials, fold stats + affine into scale/shift.
        ch_sum = jnp.sum(psum[:, :, 0], axis=0)                  # (C,)
        ch_sq = jnp.sum(psq[:, :, 0], axis=0)                    # (C,)
        mean = ch_sum / M
        var = jnp.maximum(ch_sq / M - mean * mean, 0.0)          # biased var
        inv_std = lax.rsqrt(var + eps)
        scale = gamma_f * inv_std                                # (C,)
        shift = beta_f - mean * scale                            # (C,)

        # Phase 2: y = x * scale + shift (pass 2 over x + one write).
        y3 = pl.pallas_call(
            _bn_apply_kernel,
            out_shape=jax.ShapeDtypeStruct((N, C, HW), jnp.float32),
            grid=grid,
            in_specs=[pl.BlockSpec((1, C, hw_t), lambda n, t: (n, 0, t)),
                      pl.BlockSpec((C, 1), lambda n, t: (0, 0)),
                      pl.BlockSpec((C, 1), lambda n, t: (0, 0))],
            out_specs=pl.BlockSpec((1, C, hw_t), lambda n, t: (n, 0, t)),
            compiler_params=pltpu.CompilerParams(
                dimension_semantics=("parallel", "parallel"),
                vmem_limit_bytes=_VMEM_LIMIT_BYTES),
        )(x3, scale.reshape(C, 1), shift.reshape(C, 1))

    y = y3.reshape(N, C, H, W)

    # Running-stat EMA (matches the spec module: biased variance in buffer).
    new_mu = (1.0 - momentum) * mu_running + momentum * mean
    new_sigma = (1.0 - momentum) * sigma_running + momentum * var
    return y, new_mu, new_sigma


# --------------------------- reference + self-test ---------------------------

def _ref_bn(x, gamma, beta, mu_r, sigma_r, eps=1e-5, momentum=0.1):
    """Plain-JAX reference of the spec module's training-mode forward."""
    C = x.shape[1]
    mu = jnp.mean(x, axis=(0, 2, 3), keepdims=True)
    var = jnp.var(x, axis=(0, 2, 3), keepdims=True)          # biased
    y = (x - mu) / jnp.sqrt(var + eps)
    y = gamma.reshape(1, C, 1, 1) * y + beta.reshape(1, C, 1, 1)
    new_mu = (1.0 - momentum) * mu_r + momentum * mu.reshape(C)
    new_sigma = (1.0 - momentum) * sigma_r + momentum * var.reshape(C)
    return y, new_mu, new_sigma


if __name__ == "__main__":
    key = jax.random.PRNGKey(0)
    k1, k2 = jax.random.split(key)

    # Case 1: fused single-pass path (the spec's small shape).
    N, C, H, W = 2, 4, 16, 16
    x = jax.random.normal(k1, (N, C, H, W), dtype=jnp.float32)
    gamma = jnp.ones((C,), jnp.float32)          # matches BatchNorm.__init__
    beta = jnp.zeros((C,), jnp.float32)
    mu_r = jnp.zeros((C,), jnp.float32)
    sg_r = jnp.ones((C,), jnp.float32)

    out1 = batchnorm_forward(x, gamma, beta, mu_r, sg_r, eps=1e-5, momentum=0.1)
    jax.block_until_ready(out1)
    ref1 = _ref_bn(x, gamma, beta, mu_r, sg_r)
    for a, b in zip(out1, ref1):
        assert jnp.allclose(a, b, atol=1e-4, rtol=1e-4), "fused path mismatch"

    # Case 2: two-phase streaming path on the same inputs.
    out2 = batchnorm_forward(x, gamma, beta, mu_r, sg_r, force_two_pass=True)
    jax.block_until_ready(out2)
    for a, b in zip(out2, ref1):
        assert jnp.allclose(a, b, atol=1e-4, rtol=1e-4), "two-pass mismatch"

    # Case 3: two-phase path with multiple HW tiles (exercises per-N
    # accumulation across the 'arbitrary' HW grid axis).
    N2, C2, H2, W2 = 2, 8, 32, 32                # HW = 1024 -> 2 tiles of 512
    x2 = jax.random.normal(k2, (N2, C2, H2, W2), dtype=jnp.float32)
    g2 = jnp.full((C2,), 1.5, jnp.float32)
    b2 = jnp.full((C2,), -0.25, jnp.float32)
    mu2 = jnp.zeros((C2,), jnp.float32)
    sg2 = jnp.ones((C2,), jnp.float32)
    out3 = batchnorm_forward(x2, g2, b2, mu2, sg2,
                             force_two_pass=True, tile_bytes=4096)
    jax.block_until_ready(out3)
    ref3 = _ref_bn(x2, g2, b2, mu2, sg2)
    for a, b in zip(out3, ref3):
        assert jnp.allclose(a, b, atol=1e-4, rtol=1e-4), "tiled path mismatch"

    print("KERNEL_OK")
</pallas_src>

<mosaic_0001>
module attributes {stable_mosaic.version = 11 : i64} {
  func.func @_bn_fused_kernel(%arg0: memref<2x4x256xf32, #tpu.memory_space<vmem>>, %arg1: memref<4x1xf32, #tpu.memory_space<vmem>>, %arg2: memref<4x1xf32, #tpu.memory_space<vmem>>, %arg3: memref<2x4x256xf32, #tpu.memory_space<vmem>>, %arg4: memref<4x1xf32, #tpu.memory_space<vmem>>, %arg5: memref<4x1xf32, #tpu.memory_space<vmem>>) attributes {dimension_semantics = [], scalar_prefetch = 0 : i64, scratch_operands = 0 : i64, tpu.core_type = #tpu.core_type<tc>} {
    %cst = arith.constant 0.000000e+00 : f32
    %0 = vector.broadcast %cst : f32 to vector<4x1xf32>
    %cst_0 = arith.constant 0.000000e+00 : f32
    %1 = vector.broadcast %cst_0 : f32 to vector<4x1xf32>
    %c0 = arith.constant 0 : index
    %c0_1 = arith.constant 0 : index
    %c0_2 = arith.constant 0 : index
    %2 = vector.load %arg0[%c0, %c0_1, %c0_2] : memref<2x4x256xf32, #tpu.memory_space<vmem>>, vector<1x4x256xf32>
    %3 = vector.shape_cast %2 : vector<1x4x256xf32> to vector<4x256xf32>
    %cst_3 = arith.constant dense<0.000000e+00> : vector<4xf32>
    %4 = vector.multi_reduction <add>, %3, %cst_3 [1] : vector<4x256xf32> to vector<4xf32>
    %5 = vector.shape_cast %4 : vector<4xf32> to vector<4x1xf32>
    %6 = arith.addf %0, %5 : vector<4x1xf32>
    %7 = arith.mulf %3, %3 : vector<4x256xf32>
    %cst_4 = arith.constant dense<0.000000e+00> : vector<4xf32>
    %8 = vector.multi_reduction <add>, %7, %cst_4 [1] : vector<4x256xf32> to vector<4xf32>
    %9 = vector.shape_cast %8 : vector<4xf32> to vector<4x1xf32>
    %10 = arith.addf %1, %9 : vector<4x1xf32>
    %c1 = arith.constant 1 : index
    %c0_5 = arith.constant 0 : index
    %c0_6 = arith.constant 0 : index
    %11 = vector.load %arg0[%c1, %c0_5, %c0_6] : memref<2x4x256xf32, #tpu.memory_space<vmem>>, vector<1x4x256xf32>
    %12 = vector.shape_cast %11 : vector<1x4x256xf32> to vector<4x256xf32>
    %cst_7 = arith.constant dense<0.000000e+00> : vector<4xf32>
    %13 = vector.multi_reduction <add>, %12, %cst_7 [1] : vector<4x256xf32> to vector<4xf32>
    %14 = vector.shape_cast %13 : vector<4xf32> to vector<4x1xf32>
    %15 = arith.addf %6, %14 : vector<4x1xf32>
    %16 = arith.mulf %12, %12 : vector<4x256xf32>
    %cst_8 = arith.constant dense<0.000000e+00> : vector<4xf32>
    %17 = vector.multi_reduction <add>, %16, %cst_8 [1] : vector<4x256xf32> to vector<4xf32>
    %18 = vector.shape_cast %17 : vector<4xf32> to vector<4x1xf32>
    %19 = arith.addf %10, %18 : vector<4x1xf32>
    %cst_9 = arith.constant 0.001953125 : f32
    %20 = vector.broadcast %cst_9 : f32 to vector<4x1xf32>
    %21 = arith.mulf %15, %20 : vector<4x1xf32>
    %cst_10 = arith.constant 0.001953125 : f32
    %22 = vector.broadcast %cst_10 : f32 to vector<4x1xf32>
    %23 = arith.mulf %19, %22 : vector<4x1xf32>
    %24 = arith.mulf %21, %21 : vector<4x1xf32>
    %25 = arith.subf %23, %24 : vector<4x1xf32>
    %cst_11 = arith.constant 0.000000e+00 : f32
    %26 = vector.broadcast %cst_11 : f32 to vector<4x1xf32>
    %27 = arith.maximumf %25, %26 : vector<4x1xf32>
    %cst_12 = arith.constant 9.99999974E-6 : f32
    %28 = vector.broadcast %cst_12 : f32 to vector<4x1xf32>
    %29 = arith.addf %27, %28 : vector<4x1xf32>
    %30 = math.rsqrt %29 : vector<4x1xf32>
    %c0_13 = arith.constant 0 : index
    %c0_14 = arith.constant 0 : index
    %31 = vector.load %arg1[%c0_13, %c0_14] : memref<4x1xf32, #tpu.memory_space<vmem>>, vector<4x1xf32>
    %32 = arith.mulf %31, %30 : vector<4x1xf32>
    %c0_15 = arith.constant 0 : index
    %c0_16 = arith.constant 0 : index
    %33 = vector.load %arg2[%c0_15, %c0_16] : memref<4x1xf32, #tpu.memory_space<vmem>>, vector<4x1xf32>
    %34 = arith.mulf %21, %32 : vector<4x1xf32>
    %35 = arith.subf %33, %34 : vector<4x1xf32>
    %c0_17 = arith.constant 0 : index
    %c0_18 = arith.constant 0 : index
    %c0_19 = arith.constant 0 : index
    %36 = vector.load %arg0[%c0_17, %c0_18, %c0_19] : memref<2x4x256xf32, #tpu.memory_space<vmem>>, vector<1x4x256xf32>
    %37 = vector.shape_cast %36 : vector<1x4x256xf32> to vector<4x256xf32>
    %38 = vector.broadcast %32 : vector<4x1xf32> to vector<4x256xf32>
    %39 = arith.mulf %37, %38 : vector<4x256xf32>
    %40 = vector.broadcast %35 : vector<4x1xf32> to vector<4x256xf32>
    %41 = arith.addf %39, %40 : vector<4x256xf32>
    %c0_20 = arith.constant 0 : index
    %c0_21 = arith.constant 0 : index
    %c0_22 = arith.constant 0 : index
    %42 = vector.load %arg3[%c0_20, %c0_21, %c0_22] : memref<2x4x256xf32, #tpu.memory_space<vmem>>, vector<1x4x256xf32>
    %43 = vector.shape_cast %42 : vector<1x4x256xf32> to vector<4x256xf32>
    %44 = vector.shape_cast %41 : vector<4x256xf32> to vector<1x4x256xf32>
    tpu.vector_store %arg3[%c0_20, %c0_21, %c0_22], %44 {strides = array<i32>} : memref<2x4x256xf32, #tpu.memory_space<vmem>>, vector<1x4x256xf32>,
    %c1_23 = arith.constant 1 : index
    %c0_24 = arith.constant 0 : index
    %c0_25 = arith.constant 0 : index
    %45 = vector.load %arg0[%c1_23, %c0_24, %c0_25] : memref<2x4x256xf32, #tpu.memory_space<vmem>>, vector<1x4x256xf32>
    %46 = vector.shape_cast %45 : vector<1x4x256xf32> to vector<4x256xf32>
    %47 = vector.broadcast %32 : vector<4x1xf32> to vector<4x256xf32>
    %48 = arith.mulf %46, %47 : vector<4x256xf32>
    %49 = vector.broadcast %35 : vector<4x1xf32> to vector<4x256xf32>
    %50 = arith.addf %48, %49 : vector<4x256xf32>
    %c1_26 = arith.constant 1 : index
    %c0_27 = arith.constant 0 : index
    %c0_28 = arith.constant 0 : index
    %51 = vector.load %arg3[%c1_26, %c0_27, %c0_28] : memref<2x4x256xf32, #tpu.memory_space<vmem>>, vector<1x4x256xf32>
    %52 = vector.shape_cast %51 : vector<1x4x256xf32> to vector<4x256xf32>
    %53 = vector.shape_cast %50 : vector<4x256xf32> to vector<1x4x256xf32>
    tpu.vector_store %arg3[%c1_26, %c0_27, %c0_28], %53 {strides = array<i32>} : memref<2x4x256xf32, #tpu.memory_space<vmem>>, vector<1x4x256xf32>,
    %c0_29 = arith.constant 0 : index
    %c0_30 = arith.constant 0 : index
    %54 = vector.load %arg4[%c0_29, %c0_30] : memref<4x1xf32, #tpu.memory_space<vmem>>, vector<4x1xf32>
    tpu.vector_store %arg4[%c0_29, %c0_30], %21 {strides = array<i32>} : memref<4x1xf32, #tpu.memory_space<vmem>>, vector<4x1xf32>,
    %c0_31 = arith.constant 0 : index
    %c0_32 = arith.constant 0 : index
    %55 = vector.load %arg5[%c0_31, %c0_32] : memref<4x1xf32, #tpu.memory_space<vmem>>, vector<4x1xf32>
    tpu.vector_store %arg5[%c0_31, %c0_32], %27 {strides = array<i32>} : memref<4x1xf32, #tpu.memory_space<vmem>>, vector<4x1xf32>,
    return
  }
}

</mosaic_0001>

<bundles_post_ra>
// kernel: batchnorm_forward.1
= control target key start
LH: loop header
LB: loop body
LE: loop exit
PB: predicated region body
PF: predicated region fallthrough
CT: control target
= control target key end

     0   :  { %vm24_vm0 = vcmask 1043456   ;;  %v142_v25 = vmov 0   ;;  %vm118_vm1 = vcmask 3072   ;;  %v143_v49 = vmov 839922192   ;;  %s218_s0 = inlined_call_operand.vmem [shape: f32[2,4,256], index: 0, kind: input, shape index: {}]   ;;  %s219_s4 = inlined_call_operand.vmem [shape: f32[4,1], index: 4, kind: output, shape index: {1}]   ;;  %s220_s5 = inlined_call_operand.vmem [shape: f32[4,1], index: 5, kind: output, shape index: {2}]   ;;  %s221_s1 = inlined_call_operand.vmem [shape: f32[4,1], index: 1, kind: input, shape index: {}]   ;;  %s222_s2 = inlined_call_operand.vmem [shape: f32[4,1], index: 2, kind: input, shape index: {}]   ;;  %s223_s3 = inlined_call_operand.vmem [shape: f32[2,4,256], index: 3, kind: output, shape index: {0}]  }
   0x1   :  { %v177_v0 = vld [vmem:[%s218_s0] sm:$0xff]  ;;  %v187_v7 = vld [vmem:[%s218_s0 + $0x8] sm:$0xff]  ;;  %138 = vset.pattern.permute.xlu2 %v142_v25  ;;  %139 = vset.pattern.permute.xlu0 %v142_v25  ;;  %v97_v50 = vunpack.c.l.s4 %v143_v49 }
   0x2   :  { %19 = vst [vmem:[#allocation1] ss:$2 sm:$0xff] %v177_v0  ;;  %v31_v1 = vmul.f32 %v177_v0, %v177_v0  ;;  %v58_v13 = vmul.f32 %v187_v7, %v187_v7  ;;  %v87_v43 = vld [vmem:[%s221_s1] sm:$0xf] }
   0x3   :  { %v89_v47 = vld [vmem:[%s222_s2] sm:$0xf]  ;;  %v98_v52 = vunpack.c.0.s8 %v97_v50 }
   0x9   :  { %v20_v2 = vld.sshfl [vmem:[#allocation1] sm:$0xff pattern:$0x75316420]  ;;  %v21_v3 = vld.sshfl [vmem:[#allocation1 + $0x8] sm:$0xff pattern:$0x75316420] }
   0xa   :  { %v25_v4 = vsel %vm24_vm0, %v20_v2, 0.0  ;;  %v26_v5 = vsel %vm24_vm0, %v21_v3, 0.0  ;;  %33 = vst [vmem:[#allocation1] ss:$2 sm:$0xff] %v31_v1 }
   0xb   :  { %v27_v6 = vadd.f32 %v26_v5, %v25_v4 }
   0xd   :  { %28 = vadd.xlane.f32.xlu0 %v27_v6 }
  0x11   :  { %v34_v8 = vld.sshfl [vmem:[#allocation1] sm:$0xff pattern:$0x75316420]  ;;  %v35_v9 = vld.sshfl [vmem:[#allocation1 + $0x8] sm:$0xff pattern:$0x75316420] }
  0x12   :  { %v38_v10 = vsel %vm24_vm0, %v34_v8, 0.0  ;;  %v39_v11 = vsel %vm24_vm0, %v35_v9, 0.0  ;;  %47 = vst [vmem:[#allocation1] ss:$2 sm:$0xff] %v187_v7 }
  0x13   :  { %v40_v12 = vadd.f32 %v39_v11, %v38_v10 }
  0x15   :  { %41 = vadd.xlane.f32.xlu1 %v40_v12 }
  0x19   :  { %v48_v14 = vld.sshfl [vmem:[#allocation1] sm:$0xff pattern:$0x75316420]  ;;  %v49_v15 = vld.sshfl [vmem:[#allocation1 + $0x8] sm:$0xff pattern:$0x75316420] }
  0x1a   :  { %v52_v16 = vsel %vm24_vm0, %v48_v14, 0.0  ;;  %v53_v17 = vsel %vm24_vm0, %v49_v15, 0.0  ;;  %60 = vst [vmem:[#allocation1] ss:$2 sm:$0xff] %v58_v13 }
  0x1b   :  { %v54_v18 = vadd.f32 %v53_v17, %v52_v16 }
  0x1d   :  { %55 = vadd.xlane.f32.xlu0 %v54_v18 }
  0x21   :  { %v61_v19 = vld.sshfl [vmem:[#allocation1] sm:$0xff pattern:$0x75316420]  ;;  %v62_v20 = vld.sshfl [vmem:[#allocation1 + $0x8] sm:$0xff pattern:$0x75316420] }
  0x22   :  { %v65_v21 = vsel %vm24_vm0, %v61_v19, 0.0  ;;  %v66_v22 = vsel %vm24_vm0, %v62_v20, 0.0 }
  0x23   :  { %v67_v23 = vadd.f32 %v66_v22, %v65_v21 }
  0x25   :  { %68 = vadd.xlane.f32.xlu1 %v67_v23 }
  0x80   :  { %v29_v24 = vpop.xlane.xlu0 %28 }
  0x88   :  { %v42_v26 = vpop.xlane.xlu1 %41 }
  0x90   :  { %v56_v27 = vpop.xlane.xlu0 %55 }
  0x91   :  { %v57_v28 = vadd.f32 %v56_v27, %v29_v24 }
  0x93   :  { %v71_v29 = vmul.f32 0.001953125, %v57_v28 }
  0x95   :  { %119 = vst.msk [vmem:[%s219_s4] sm:$0xf] %vm118_vm1, %v71_v29  ;;  %v73_v33 = vmul.f32 %v71_v29, %v71_v29 }
  0x98   :  { %v69_v30 = vpop.xlane.xlu1 %68 }
  0x99   :  { %v70_v31 = vadd.f32 %v69_v30, %v42_v26 }
  0x9b   :  { %v72_v32 = vmul.f32 0.001953125, %v70_v31 }
  0x9d   :  { %v74_v34 = vsub.f32 %v72_v32, %v73_v33 }
  0x9f   :  { %v75_v35 = vmax.f32 %v74_v34, 0.0 }
  0xa1   :  { %v76_v36 = vadd.f32 1e-05, %v75_v35  ;;  %120 = vst.msk [vmem:[%s220_s5] sm:$0xf] %vm118_vm1, %v75_v35 }
  0xa3   :  { %140 = vrsqrt.f32 %v76_v36  ;;  %vm83_vm3 = vweird.f32 %v76_v36 }
  0xa9   :  { %v141_v37 = vpop.eup %140 }
  0xaa   :  { %v78_v38 = vmul.f32 %v141_v37, %v76_v36  ;;  %vm84_vm2 = vweird.f32 %v141_v37 }
  0xab   :  { %vm85_vm4 = vmor %vm83_vm3, %vm84_vm2 }
  0xac   :  { %v79_v39 = vmul.f32 %v141_v37, %v78_v38 }
  0xae   :  { %v80_v40 = vmul.f32 0.5, %v79_v39 }
  0xb0   :  { %v81_v41 = vsub.f32 1.5, %v80_v40 }
  0xb2   :  { %v82_v42 = vmul.f32 %v141_v37, %v81_v41 }
  0xb4   :  { %v86_v44 = vsel %vm85_vm4, %v141_v37, %v82_v42 }
  0xb5   :  { %v88_v45 = vmul.f32 %v87_v43, %v86_v44 }
  0xb7   :  { %94 = vperm.xlu2 %138, %v88_v45   ;;  %v90_v46 = vmul.f32 %v88_v45, %v71_v29 }
  0xb9   :  { %v91_v48 = vsub.f32 %v89_v47, %v90_v46 }
  0xbf   :  { %104 = vperm.xlu2 %138, %v91_v48  }
 0x111   :  { %v95_v51 = vpop.permute.xlu2 %94 }
 0x112   :  { %v99_v53 = vperm.slane %v95_v51, %v98_v52 }
 0x114   :  { %v101_v55 = vmul.f32 %v99_v53, %v177_v0  ;;  %v114_v56 = vmul.f32 %v187_v7, %v99_v53 }
 0x119   :  { %v105_v54 = vpop.permute.xlu2 %104 }
 0x11a   :  { %v109_v57 = vperm.slane %v105_v54, %v98_v52 }
 0x11c   :  { %v111_v58 = vadd.f32 %v109_v57, %v101_v55  ;;  %v115_v59 = vadd.f32 %v114_v56, %v109_v57 }
 0x11e   :  { %112 = vst [vmem:[%s223_s3] sm:$0xff] %v111_v58 }
 0x11f   :  { %135 = vst [vmem:[%s223_s3 + $0x8] sm:$0xff] %v115_v59 }

</bundles_post_ra>
